<compile_context>
chip_gen: v6e
topology: v6e:2x2x1
jax: 0.10.0
libtpu: 0.0.40
codegen_flags: <defaults>
</compile_context>

<pallas_src>
import functools

import jax
import jax.numpy as jnp
from jax import lax
from jax.experimental import pallas as pl
from jax.experimental.pallas import tpu as pltpu

BN_EPS = 1e-5
_LANE = 128
_MAX_TL = 512   # length tile (lanes); big enough to amortize per-step overhead,
                # small enough for the 16/32 MiB scoped-VMEM defaults (v5e/v6e/v7x).


def _round_up(v, m):
    return ((v + m - 1) // m) * m


def _fr_stats_kernel(x_ref, w_ref, stats_ref):
    # x_ref:     (1, C_in, TL)    strided-input tile (batch n, length tile l)
    # w_ref:     (C_out, C_in)    resident across grid steps
    # stats_ref: (1, 1, C_out, 2) per-tile [sum, sum_of_squares] per channel
    x = x_ref[0]
    w = w_ref[...]
    # 1x1 conv (stride handled outside) == matmul on the MXU, f32 accumulation.
    y = jnp.dot(w, x, preferred_element_type=jnp.float32)      # (C_out, TL)
    s1 = jnp.sum(y, axis=1, keepdims=True)                      # (C_out, 1)
    s2 = jnp.sum(y * y, axis=1, keepdims=True)                  # (C_out, 1)
    stats_ref[0, 0] = jnp.concatenate([s1, s2], axis=1)         # (C_out, 2)


def _fr_apply_kernel(x_ref, w_ref, scale_ref, shift_ref, o_ref):
    # x_ref:   (1, C_in, TL)
    # w_ref:   (C_out, C_in)
    # scale:   (C_out, 1)  = gamma * rsqrt(var + eps)
    # shift:   (C_out, 1)  = beta - mean * gamma * rsqrt(var + eps)
    # o_ref:   (1, C_out, TL)   lane-dense (TL multiple of 128)
    x = x_ref[0]
    w = w_ref[...]
    y = jnp.dot(w, x, preferred_element_type=jnp.float32)       # (C_out, TL)
    out = y * scale_ref[...] + shift_ref[...]
    o_ref[0] = jnp.maximum(out, 0.0).astype(o_ref.dtype)


@functools.partial(jax.jit, static_argnames=("use_bf16_matmul",))
def factorized_reduce(x, w, gamma, beta, *, use_bf16_matmul=False):
    """x: (N, C_in, L) f32; w: (C_out, C_in); gamma/beta: (C_out,) -> (N, C_out, L_out)."""
    N, C_in, L = x.shape
    C_out = w.shape[0]
    assert C_out % 2 == 0

    # Stride-2 "reduce" along L == Conv1d(kernel_size=1, stride=2, padding=0).
    # Kept as one wrapper-side slice (lane-strided reads inside the kernel are not
    # reliably supported); it touches only the smaller pre-conv tensor once, and
    # everything downstream stays in NCL with no transposes.
    x_s = x[:, :, ::2]                                   # (N, C_in, L_out)
    L_out = x_s.shape[-1]

    # Length tile: multiple of 128 (lane-dense), capped for VMEM.
    TL = min(_MAX_TL, _round_up(L_out, _LANE))
    L_pad = _round_up(L_out, TL)
    num_l = L_pad // TL
    if L_pad != L_out:
        # Zero padding contributes nothing to the BN sums (W @ 0 == 0).
        x_s = jnp.pad(x_s, ((0, 0), (0, 0), (0, L_pad - L_out)))

    # Optional bf16 MXU inputs; all accumulation and BN math stays in f32.
    comp_dtype = jnp.bfloat16 if use_bf16_matmul else x.dtype
    x_k = x_s.astype(comp_dtype)
    w_k = w.astype(comp_dtype)

    cparams = pltpu.CompilerParams(
        dimension_semantics=("parallel", "parallel"),
        vmem_limit_bytes=32 * 1024 * 1024,
    )

    x_spec = pl.BlockSpec((1, C_in, TL), lambda n, l: (n, 0, l))
    w_spec = pl.BlockSpec((C_out, C_in), lambda n, l: (0, 0))       # resident

    # Pass 1: per-tile per-channel [sum, sumsq] partials.
    stats = pl.pallas_call(
        _fr_stats_kernel,
        out_shape=jax.ShapeDtypeStruct((N, num_l, C_out, 2), jnp.float32),
        grid=(N, num_l),
        in_specs=[x_spec, w_spec],
        out_specs=pl.BlockSpec((1, 1, C_out, 2), lambda n, l: (n, l, 0, 0)),
        compiler_params=cparams,
    )(x_k, w_k)

    # Tiny per-channel reduction + BN folding in plain JAX (C_out-sized).
    m_count = jnp.float32(N * L_out)
    sums = jnp.sum(stats, axis=(0, 1))                           # (C_out, 2)
    mean = sums[:, 0] / m_count
    var = jnp.maximum(sums[:, 1] / m_count - mean * mean, 0.0)   # biased variance
    inv = lax.rsqrt(var + BN_EPS)
    scale = (gamma * inv).astype(jnp.float32).reshape(C_out, 1)
    shift = (beta - mean * gamma * inv).astype(jnp.float32).reshape(C_out, 1)

    # Pass 2: recompute the cheap matmul, apply fused BN scale/shift + ReLU.
    vec_spec = pl.BlockSpec((C_out, 1), lambda n, l: (0, 0))        # resident
    out_pad = pl.pallas_call(
        _fr_apply_kernel,
        out_shape=jax.ShapeDtypeStruct((N, C_out, L_pad), jnp.float32),
        grid=(N, num_l),
        in_specs=[x_spec, w_spec, vec_spec, vec_spec],
        out_specs=pl.BlockSpec((1, C_out, TL), lambda n, l: (n, 0, l)),
        compiler_params=cparams,
    )(x_k, w_k, scale, shift)

    if L_pad != L_out:
        out_pad = out_pad[:, :, :L_out]
    return out_pad


def _reference(x, w, gamma, beta):
    # Pure-JAX reference (Conv1d k=1 s=2 no-bias -> BatchNorm1d training -> ReLU).
    x_s = x[:, :, ::2]                                   # (N, C_in, L_out)
    y = jnp.einsum("oc,ncl->nol", w, x_s)
    mean = jnp.mean(y, axis=(0, 2), keepdims=True)
    var = jnp.mean((y - mean) ** 2, axis=(0, 2), keepdims=True)
    y_hat = (y - mean) * lax.rsqrt(var + BN_EPS)
    out = y_hat * gamma[None, :, None] + beta[None, :, None]
    return jnp.maximum(out, 0.0)


if __name__ == "__main__":
    key = jax.random.PRNGKey(0)
    k_x, k_w = jax.random.split(key)

    N, C_in, L = 2, 4, 16
    C_out = 8

    x = jax.random.normal(k_x, (N, C_in, L), dtype=jnp.float32)
    # Conv1d weight (C_out, C_in, 1) squeezed to (C_out, C_in); deterministic init.
    bound = 1.0 / (C_in ** 0.5)
    w = jax.random.uniform(k_w, (C_out, C_in), dtype=jnp.float32,
                           minval=-bound, maxval=bound)
    # BatchNorm1d affine params at PyTorch defaults.
    gamma = jnp.ones((C_out,), dtype=jnp.float32)
    beta = jnp.zeros((C_out,), dtype=jnp.float32)

    ref = _reference(x, w, gamma, beta)

    # f32 path: exact PyTorch semantics.
    out = jax.block_until_ready(factorized_reduce(x, w, gamma, beta))
    assert out.shape == (N, C_out, (L - 1) // 2 + 1)
    assert jnp.allclose(out, ref, atol=1e-5, rtol=1e-5)

    # bf16-MXU path (v6e/v7x memory-bandwidth optimization): looser tolerance.
    out_bf16 = jax.block_until_ready(
        factorized_reduce(x, w, gamma, beta, use_bf16_matmul=True))
    assert out_bf16.shape == out.shape
    assert jnp.allclose(out_bf16, ref, atol=5e-2, rtol=5e-2)

    print("KERNEL_OK")
</pallas_src>

<mosaic_0001>
module attributes {stable_mosaic.version = 11 : i64} {
  func.func @_fr_stats_kernel(%arg0: i32, %arg1: i32, %arg2: memref<1x4x128xf32, #tpu.memory_space<vmem>>, %arg3: memref<8x4xf32, #tpu.memory_space<vmem>>, %arg4: memref<1x1x8x2xf32, #tpu.memory_space<vmem>>) attributes {dimension_semantics = [#tpu.dimension_semantics<parallel>, #tpu.dimension_semantics<parallel>], iteration_bounds = array<i64: 2, 1>, scalar_prefetch = 0 : i64, scratch_operands = 0 : i64, tpu.core_type = #tpu.core_type<tc>, window_params = [{transform_indices = @transform_0, window_bounds = array<i64: 1, 4, 128>}, {pipeline_mode = #tpu.pipeline_mode<synchronous>, transform_indices = @transform_1, window_bounds = array<i64: 8, 4>}, {transform_indices = @transform_2, window_bounds = array<i64: 1, 1, 8, 2>}]} {
    %c0 = arith.constant 0 : index
    %c0_0 = arith.constant 0 : index
    %c0_1 = arith.constant 0 : index
    %0 = vector.load %arg2[%c0, %c0_0, %c0_1] : memref<1x4x128xf32, #tpu.memory_space<vmem>>, vector<1x4x128xf32>
    %1 = vector.shape_cast %0 : vector<1x4x128xf32> to vector<4x128xf32>
    %c0_2 = arith.constant 0 : index
    %c0_3 = arith.constant 0 : index
    %2 = vector.load %arg3[%c0_2, %c0_3] : memref<8x4xf32, #tpu.memory_space<vmem>>, vector<8x4xf32>
    %cst = arith.constant dense<0.000000e+00> : vector<8x128xf32>
    %3 = tpu.matmul %2, %1, %cst {dimension_numbers = #tpu.dot_dimension_numbers<[1], [0], [0], [1], [0, 0, 1, 1], [], []>} : vector<8x4xf32>, vector<4x128xf32>, vector<8x128xf32> -> vector<8x128xf32>
    %cst_4 = arith.constant dense<0.000000e+00> : vector<8xf32>
    %4 = vector.multi_reduction <add>, %3, %cst_4 [1] : vector<8x128xf32> to vector<8xf32>
    %5 = vector.shape_cast %4 : vector<8xf32> to vector<8x1xf32>
    %6 = arith.mulf %3, %3 : vector<8x128xf32>
    %cst_5 = arith.constant dense<0.000000e+00> : vector<8xf32>
    %7 = vector.multi_reduction <add>, %6, %cst_5 [1] : vector<8x128xf32> to vector<8xf32>
    %8 = vector.shape_cast %7 : vector<8xf32> to vector<8x1xf32>
    %9 = tpu.concatenate %5, %8 in 1 : vector<8x1xf32>, vector<8x1xf32> -> vector<8x2xf32>
    %c0_6 = arith.constant 0 : index
    %c0_7 = arith.constant 0 : index
    %c0_8 = arith.constant 0 : index
    %c0_9 = arith.constant 0 : index
    %10 = vector.load %arg4[%c0_6, %c0_7, %c0_8, %c0_9] : memref<1x1x8x2xf32, #tpu.memory_space<vmem>>, vector<1x1x8x2xf32>
    %11 = vector.shape_cast %10 : vector<1x1x8x2xf32> to vector<8x2xf32>
    %12 = vector.shape_cast %9 : vector<8x2xf32> to vector<1x1x8x2xf32>
    tpu.vector_store %arg4[%c0_6, %c0_7, %c0_8, %c0_9], %12 {strides = array<i32>} : memref<1x1x8x2xf32, #tpu.memory_space<vmem>>, vector<1x1x8x2xf32>,
    return
  }
  func.func @transform_0(%arg0: i32, %arg1: i32) -> (i32, i32, i32) {
    %c0_i32 = arith.constant 0 : i32
    %c0_i32_0 = arith.constant 0 : i32
    return %arg0, %c0_i32, %arg1 : i32, i32, i32
  }
  func.func @transform_1(%arg0: i32, %arg1: i32) -> (i32, i32) {
    %c0_i32 = arith.constant 0 : i32
    %c0_i32_0 = arith.constant 0 : i32
    %c0_i32_1 = arith.constant 0 : i32
    return %c0_i32, %c0_i32_0 : i32, i32
  }
  func.func @transform_2(%arg0: i32, %arg1: i32) -> (i32, i32, i32, i32) {
    %c0_i32 = arith.constant 0 : i32
    %c0_i32_0 = arith.constant 0 : i32
    %c0_i32_1 = arith.constant 0 : i32
    return %arg0, %arg1, %c0_i32, %c0_i32_0 : i32, i32, i32, i32
  }
}

module attributes {stable_mosaic.version = 11 : i64} {
  func.func @_fr_apply_kernel(%arg0: i32, %arg1: i32, %arg2: memref<1x4x128xf32, #tpu.memory_space<vmem>>, %arg3: memref<8x4xf32, #tpu.memory_space<vmem>>, %arg4: memref<8x1xf32, #tpu.memory_space<vmem>>, %arg5: memref<8x1xf32, #tpu.memory_space<vmem>>, %arg6: memref<1x8x128xf32, #tpu.memory_space<vmem>>) attributes {dimension_semantics = [#tpu.dimension_semantics<parallel>, #tpu.dimension_semantics<parallel>], iteration_bounds = array<i64: 2, 1>, scalar_prefetch = 0 : i64, scratch_operands = 0 : i64, tpu.core_type = #tpu.core_type<tc>, window_params = [{transform_indices = @transform_0, window_bounds = array<i64: 1, 4, 128>}, {pipeline_mode = #tpu.pipeline_mode<synchronous>, transform_indices = @transform_1, window_bounds = array<i64: 8, 4>}, {pipeline_mode = #tpu.pipeline_mode<synchronous>, transform_indices = @transform_2, window_bounds = array<i64: 8, 1>}, {pipeline_mode = #tpu.pipeline_mode<synchronous>, transform_indices = @transform_3, window_bounds = array<i64: 8, 1>}, {transform_indices = @transform_4, window_bounds = array<i64: 1, 8, 128>}]} {
    %c0 = arith.constant 0 : index
    %c0_0 = arith.constant 0 : index
    %c0_1 = arith.constant 0 : index
    %0 = vector.load %arg2[%c0, %c0_0, %c0_1] : memref<1x4x128xf32, #tpu.memory_space<vmem>>, vector<1x4x128xf32>
    %1 = vector.shape_cast %0 : vector<1x4x128xf32> to vector<4x128xf32>
    %c0_2 = arith.constant 0 : index
    %c0_3 = arith.constant 0 : index
    %2 = vector.load %arg3[%c0_2, %c0_3] : memref<8x4xf32, #tpu.memory_space<vmem>>, vector<8x4xf32>
    %cst = arith.constant dense<0.000000e+00> : vector<8x128xf32>
    %3 = tpu.matmul %2, %1, %cst {dimension_numbers = #tpu.dot_dimension_numbers<[1], [0], [0], [1], [0, 0, 1, 1], [], []>} : vector<8x4xf32>, vector<4x128xf32>, vector<8x128xf32> -> vector<8x128xf32>
    %c0_4 = arith.constant 0 : index
    %c0_5 = arith.constant 0 : index
    %4 = vector.load %arg4[%c0_4, %c0_5] : memref<8x1xf32, #tpu.memory_space<vmem>>, vector<8x1xf32>
    %5 = vector.broadcast %4 : vector<8x1xf32> to vector<8x128xf32>
    %6 = arith.mulf %3, %5 : vector<8x128xf32>
    %c0_6 = arith.constant 0 : index
    %c0_7 = arith.constant 0 : index
    %7 = vector.load %arg5[%c0_6, %c0_7] : memref<8x1xf32, #tpu.memory_space<vmem>>, vector<8x1xf32>
    %8 = vector.broadcast %7 : vector<8x1xf32> to vector<8x128xf32>
    %9 = arith.addf %6, %8 : vector<8x128xf32>
    %cst_8 = arith.constant 0.000000e+00 : f32
    %10 = vector.broadcast %cst_8 : f32 to vector<8x128xf32>
    %11 = arith.maximumf %9, %10 : vector<8x128xf32>
    %c0_9 = arith.constant 0 : index
    %c0_10 = arith.constant 0 : index
    %c0_11 = arith.constant 0 : index
    %12 = vector.load %arg6[%c0_9, %c0_10, %c0_11] : memref<1x8x128xf32, #tpu.memory_space<vmem>>, vector<1x8x128xf32>
    %13 = vector.shape_cast %12 : vector<1x8x128xf32> to vector<8x128xf32>
    %14 = vector.shape_cast %11 : vector<8x128xf32> to vector<1x8x128xf32>
    tpu.vector_store %arg6[%c0_9, %c0_10, %c0_11], %14 {strides = array<i32>} : memref<1x8x128xf32, #tpu.memory_space<vmem>>, vector<1x8x128xf32>,
    return
  }
  func.func @transform_0(%arg0: i32, %arg1: i32) -> (i32, i32, i32) {
    %c0_i32 = arith.constant 0 : i32
    %c0_i32_0 = arith.constant 0 : i32
    return %arg0, %c0_i32, %arg1 : i32, i32, i32
  }
  func.func @transform_1(%arg0: i32, %arg1: i32) -> (i32, i32) {
    %c0_i32 = arith.constant 0 : i32
    %c0_i32_0 = arith.constant 0 : i32
    %c0_i32_1 = arith.constant 0 : i32
    return %c0_i32, %c0_i32_0 : i32, i32
  }
  func.func @transform_2(%arg0: i32, %arg1: i32) -> (i32, i32) {
    %c0_i32 = arith.constant 0 : i32
    %c0_i32_0 = arith.constant 0 : i32
    %c0_i32_1 = arith.constant 0 : i32
    return %c0_i32, %c0_i32_0 : i32, i32
  }
  func.func @transform_3(%arg0: i32, %arg1: i32) -> (i32, i32) {
    %c0_i32 = arith.constant 0 : i32
    %c0_i32_0 = arith.constant 0 : i32
    %c0_i32_1 = arith.constant 0 : i32
    return %c0_i32, %c0_i32_0 : i32, i32
  }
  func.func @transform_4(%arg0: i32, %arg1: i32) -> (i32, i32, i32) {
    %c0_i32 = arith.constant 0 : i32
    %c0_i32_0 = arith.constant 0 : i32
    return %arg0, %c0_i32, %arg1 : i32, i32, i32
  }
}

</mosaic_0001>

<bundles_post_ra>
// kernel: factorized_reduce.2
= control target key start
LH: loop header
LB: loop body
LE: loop exit
PB: predicated region body
PF: predicated region fallthrough
CT: control target
= control target key end

     0   :  { %s418_s9 = smov 0   ;;  %s420_s10 = smov 0   ;;  %s454_s0 = inlined_call_operand.vmem [shape: f32[2,4,128], index: 0, kind: input, shape index: {}]   ;;  %s455_s1 = inlined_call_operand.vmem [shape: f32[8,4], index: 1, kind: input, shape index: {}]   ;;  %s456_s2 = inlined_call_operand.vmem [shape: f32[2,1,8,2], index: 2, kind: output, shape index: {}]  }
   0x1   :  { %s422_s11 = smov 0  }
   0x2 LB: > { %s24_s12 = sadd.s32 1, %s395_s10  ;;  %p337_p0 = scmp.ge.s32.totalorder %s399_s11, 1  ;;  %s399_s11 = sphi %s422_s11, %s12_s11   ;;  %s395_s10 = sphi %s420_s10, %s458_s10   ;;  %s391_s9 = sphi %s418_s9, %s457_s9  }
   0x3   : > { %p26_p1 = scmp.ge.s32.totalorder %s24_s12, 2  ;;  %p130_p2 = scmp.lt.s32.totalorder %s399_s11, 3 }
   0x5   : > { %s460_s12 = smov (%p26_p1, %s24_s12), 0  ;;  %p131_p3 = pnand %p337_p0, %p130_p2 }
   0x6   : > { %p156_p4 = scmp.lt.s32.totalorder (!%p131_p3), %s391_s9, 1 }
   0x7   : > { %134 = sbr.rel (%p131_p3) target bundleno = 354 (0x162), region = 28 }
   0xc   : > { %v401_v0 = vmov 0.0   ;;  %vm402_vm0 = vmmov 0   ;;  %s462_s9 = smov (!%p156_p4, %s391_s9), 1  ;;  %vm176_vm1 = vcmask 1043456   ;;  %v171_v1 = vld [vmem:[%s455_s1] sm:$0xff]  ;;  %vm172_vm2 = vcmask 31744  }
   0xd   : > { %346 = vmatprep.subr.mxu0 %v401_v0  ;;  %348 = vmatprep.mubr.msk.f32.mxu0 %vm402_vm0, %v401_v0  ;;  %s338_s13 = sshll.u32 %s462_s9, 2  ;;  %s339_s19 = sshll.u32 %s462_s9, 3  ;;  %vm255_vm3 = vcmask 7168   ;;  %vm257_vm4 = vcmask 15360  }
   0xe   : > { %s162_s16 = scalar_lea.vmem %s454_s0, %s338_s13  ;;  %s169_s22 = scalar_lea.vmem %s456_s2, %s339_s19 }
   0xf   : > { %v170_v2 = vld [vmem:[%s162_s16] sm:$0xf] }
  0x10   : > { %347 = vmatpush3.msk.msra.mxu0 %vm176_vm1, %v170_v2 }
  0x11   : > { %349 = vmatmul.mubr.msk.f32.vlgmr.msra.gmra.mxu0 %vm172_vm2, %v171_v1 }
  0xd1   : > { %v246_v3 = vpop.f32.mrf.mxu0 }
  0xd2   : > { %250 = vadd.xlane.f32.xlu0 %v246_v3  ;;  %v252_v5 = vmul.f32 %v246_v3, %v246_v3 }
  0xd3   : > { %v350_v4 = vpop.f32.mrf.mxu0 }
  0xd6   : > { %253 = vadd.xlane.f32.xlu0 %v252_v5 }
 0x15b   : > { %v251_v6 = vpop.xlane.xlu0 %250 }
 0x15f   : > { %v254_v7 = vpop.xlane.xlu0 %253 }
 0x160   : > { %v256_v8 = vsel %vm255_vm3, %v251_v6, %v254_v7 }
 0x161   : > { %258 = vst.msk [vmem:[%s169_s22] sm:$0xff] %vm257_vm4, %v256_v8 }
 0x162 PF: > { %s12_s11 = sadd.s32 1, %s399_s11   ;;  %s457_s9 = smov %s395_s10 }
 0x163   : > { %p9_p5 = scmp.ge.s32.totalorder %s12_s11, 4   ;;  %s458_s10 = smov %s460_s12 }
 0x165   :  { %11 = sbr.rel (!%p9_p5) target bundleno = 2 (0x2), region = 58 }

// kernel: factorized_reduce.3
= control target key start
LH: loop header
LB: loop body
LE: loop exit
PB: predicated region body
PF: predicated region fallthrough
CT: control target
= control target key end

     0   :  { %9 = vsyncpa [#allocation3], 0  ;;  %s694_s0 = inlined_call_operand.vmem [shape: f32[2,4,128], index: 0, kind: input, shape index: {}]   ;;  %s695_s1 = inlined_call_operand.vmem [shape: f32[8,4], index: 1, kind: input, shape index: {}]   ;;  %s696_s2 = inlined_call_operand.vmem [shape: f32[8,1], index: 2, kind: input, shape index: {}]   ;;  %s697_s3 = inlined_call_operand.vmem [shape: f32[8,1], index: 3, kind: input, shape index: {}]   ;;  %s698_s4 = inlined_call_operand.hbm [shape: f32[2,8,128], index: 4, kind: output, shape index: {}]  }
   0x1   :  { %11 = vsyncpa [#allocation3 + $0x1], 0  ;;  %s586_s15 = smov 0   ;;  %s588_s16 = smov 0  }
   0x2   :  { %s590_s17 = smov 0   ;;  %s592_s18 = smov 0  }
   0x3   :  { %s594_s19 = smov 0   ;;  %s596_s20 = smov 0  }
   0x4 LB: > { %s400_s21 = sadd.s32 4294967295, %s555_s20   ;;  %s401_s22 = sadd.s32 4294967294, %s555_s20   ;;  %s555_s20 = sphi %s596_s20, %s17_s20   ;;  %s551_s19 = sphi %s594_s19, %s705_s19   ;;  %s547_s18 = sphi %s592_s18, %s704_s18   ;;  %s543_s17 = sphi %s590_s17, %s703_s17   ;;  %s539_s16 = sphi %s588_s16, %s702_s16   ;;  %s535_s15 = sphi %s586_s15, %s701_s15  }
   0x5   : > { %s29_s23 = sadd.s32 1, %s551_s19  ;;  %s129_s24 = sadd.s32 1, %s543_s17 }
   0x6   : > { %p31_p0 = scmp.ge.s32.totalorder %s29_s23, 2  ;;  %p139_p1 = scmp.ne.s32.totalorder %s543_s17, %s539_s16 }
   0x7   : > { %p140_p2 = scmp.eq.s32.totalorder %s400_s21, 1  ;;  %p145_p3 = scmp.ne.s32.totalorder %s539_s16, %s535_s15 }
   0x8   : > { %s707_s23 = smov (%p31_p0, %s29_s23), 0  ;;  %p146_p5 = scmp.eq.s32.totalorder %s401_s22, 1 }
   0x9   : > { %p626_p4 = por %p140_p2, %p139_p1  ;;  %s124_s26 = ssub.s32 %s551_s19, %s707_s23 }
   0xa   : > { %p404_p6 = scmp.ge.s32.totalorder %s555_s20, 1  ;;  %p127_p7 = scmp.eq.s32.totalorder %s124_s26, 0 }
   0xb   : > { %p633_p8 = por %p146_p5, %p145_p3  ;;  %p183_p9 = scmp.lt.s32.totalorder %s555_s20, 3 }
   0xc   : > { %s639_s28 = scalar_select %p127_p7, %s543_s17, %s129_s24  }
   0xd   : > { %p184_p10 = pnand %p404_p6, %p183_p9 }
   0xe   : > { %p211_p11 = scmp.lt.s32.totalorder (!%p184_p10), %s547_s18, 1  ;;  %s208_s14 = sand.u32 (!%p184_p10), 1, %s539_s16  }
   0xf   : > { %187 = sbr.rel (%p184_p10) target bundleno = 238 (0xee), region = 36  ;;  %s405_s21 = sshll.u32 (!%p184_p10), %s208_s14, 3 }
  0x10   : > { %s410_s22 = sshll.u32 (!%p184_p10), %s547_s18, 7  ;;  %s210_s24 = scalar_lea.vmem (!%p184_p10), [#allocation2], %s405_s21 }
  0x11   : > { %s329_s26 = sshll.u32 (!%p184_p10), %s210_s24, 4  ;;  %s560_s8 = smov (!%p184_p10), [#allocation2]   ;;  %s330_s26 = int_to_ptr.vmem [resolvable:$true] %s329_s26 }
  0x12   : > { %s479_s7 = scalar_lea.vmem (!%p184_p10), %s330_s26, 128  ;;  %s483_s9 = sshll.u32 (!%p184_p10), %s560_s8, 4  ;;  %s484_s9 = int_to_ptr.vmem [resolvable:$false] %s483_s9 }
  0x13   : > { %p480_p12 = scmp.ne.s32.totalorder (!%p184_p10), %s330_s26, %s479_s7  ;;  %p486_p1 = scmp.lt.s32.totalorder (!%p184_p10), %s330_s26, %s484_s9 }
  0x14   : > { %v557_v0 = vmov 0.0   ;;  %vm558_vm0 = vmmov 0   ;;  %v298_v1 = vld [vmem:[%s696_s2] sm:$0xff]  ;;  %s212_s5 = scalar_select %p211_p11, %s547_s18, 1  ;;  %v559_v2 = vmov 0   ;;  %vm224_vm1 = vcmask 1043456  }
  0x15   : > { %415 = vmatprep.subr.mxu0 %v557_v0  ;;  %417 = vmatprep.mubr.msk.f32.mxu0 %vm558_vm0, %v557_v0  ;;  %v305_v3 = vld [vmem:[%s697_s3] sm:$0xff]  ;;  %vm220_vm2 = vcmask 31744   ;;  %p481_p13 = pnand %p480_p12, %p626_p4  ;;  %s485_s18 = scalar_lea.vmem %s484_s9, 256 }
  0x16   : > { %478 = vset.pattern.permute.xlu0 %v559_v2  ;;  %s406_s6 = sshll.u32 %s212_s5, 2  ;;  %v219_v4 = vld [vmem:[%s695_s1] sm:$0xff]  ;;  %s327_s5 = scalar_lea.hbm %s698_s4, %s410_s22 }
  0x17   : > { %301 = vperm.xlu0 %478, %v298_v1   ;;  %s217_s11 = scalar_lea.vmem %s694_s0, %s406_s6  ;;  %s315_s6 = scalar_lea.sflag [#allocation3], %s208_s14 }
  0x18   : > { %v218_v5 = vld [vmem:[%s217_s11] sm:$0xf]  ;;  %p482_p0 = pneg %p481_p13  ;;  %p487_p2 = scmp.lt.s32.totalorder %s485_s18, %s479_s7 }
  0x19   : > { %416 = vmatpush3.msk.msra.mxu0 %vm224_vm1, %v218_v5 }
  0x1a   : > { %418 = vmatmul.mubr.msk.f32.vlgmr.msra.gmra.mxu0 %vm220_vm2, %v219_v4  ;;  %p488_p3 = por %p487_p2, %p486_p1 }
  0x1b   : > { %308 = vperm.xlu0 %478, %v305_v3  }
  0x1c   : > { %p489_p5 = pnand %p488_p3, %p482_p0 }
  0x92   : > { %v302_v6 = vpop.permute.xlu0 %301 }
  0x96   : > { %v309_v9 = vpop.permute.xlu0 %308 }
  0xda   : > { %v294_v7 = vpop.f32.mrf.mxu0 }
  0xdb   : > { %v304_v8 = vmul.f32 %v302_v6, %v294_v7 }
  0xdc   : > { %v419_v10 = vpop.f32.mrf.mxu0 }
  0xdd   : > { %v311_v11 = vadd.f32 %v309_v9, %v304_v8 }
  0xdf   : > { %v312_v12 = vmax.f32 %v311_v11, 0.0 }
  0xe1   : > { %313 = vst [vmem:[%s210_s24] sm:$0xff] %v312_v12 }
  0xe2   : > { %492 = shalt.err (!%p489_p5)
}
  0xe3   : > { %s493_s10 = scalar_lea.hbm %s327_s5, 128  ;;  %s497_s13 = scalar_lea.hbm %s698_s4, 256 }
  0xe4   : > { %p494_p6 = scmp.ne.s32.totalorder %s327_s5, %s493_s10  ;;  %p498_p10 = scmp.lt.s32.totalorder %s327_s5, %s698_s4 }
  0xe5   : > { %p499_p11 = scmp.lt.s32.totalorder %s497_s13, %s493_s10 }
  0xe6   : > { %p495_p7 = pnand %p494_p6, %p626_p4 }
  0xe7   : > { %p500_p12 = por %p499_p11, %p498_p10 }
  0xe8   : > { %p496_p9 = pneg %p495_p7 }
  0xea   : > { %p501_p13 = pnand %p500_p12, %p496_p9 }
  0xec   : > { %504 = shalt.err (!%p501_p13)
}
  0xed   : > { %420 = dma.vmem_to_hbm [thread:$0]  (%p626_p4), %s330_s26, 128, %s327_s5, %s315_s6  }
  0xee PF: > { %p426_p0 = scmp.ge.s32.totalorder %s555_s20, 2  ;;  %s341_s22 = sand.u32 1, %s535_s15  }
  0xef   : > { %s342_s24 = scalar_lea.sflag [#allocation3], %s341_s22 }
  0xf0   : > { %p423_p1 = pnand %p426_p0, %p633_p8 }
  0xf2   : > { %p424_p2 = pneg %p423_p1 }
  0xf4   : > { %530 = dma.done.wait (%p424_p2), %s342_s24, 128  }
  0xf5   : > { %532 = vsyncadd (%p424_p2), %s342_s24, 4294967168  ;;  %s17_s20 = sadd.s32 1, %s555_s20   ;;  %s701_s15 = smov %s539_s16 }
  0xf6   : > { %p14_p3 = scmp.ge.s32.totalorder %s17_s20, 4   ;;  %s702_s16 = smov %s543_s17 }
  0xf7   : > { %s703_s17 = smov %s639_s28  ;;  %s704_s18 = smov %s551_s19 }
  0xf8   : > { %s705_s19 = smov %s707_s23  ;;  %16 = sbr.rel (!%p14_p3) target bundleno = 4 (0x4), region = 71 }
  0xfd   :  { %347 = vsyncpa [#allocation3], 1 }
  0xfe   :  { %349 = vsyncpa [#allocation3 + $0x1], 1 }

</bundles_post_ra>
